<compile_context>
chip_gen: v7x
topology: tpu7x:2x2x1
jax: 0.10.0
libtpu: 0.0.40
codegen_flags: <defaults>
</compile_context>

<pallas_src>
import jax
import jax.numpy as jnp
from jax.experimental import pallas as pl
from jax.experimental.pallas import tpu as pltpu


def _se_kernel(x_ref, w_ref, o_ref):
    # x_ref: (C, TM)        pixel-column tile (channels on sublanes, pixels on lanes)
    # w_ref: (2*Cout, C)    [keep_x_size ; convup @ convdown] fused weight
    # o_ref: (Cout, TM)
    cout = o_ref.shape[0]
    z = jnp.dot(w_ref[...], x_ref[...], preferred_element_type=jnp.float32)  # (2*Cout, TM)
    x1 = z[:cout, :]
    gate = jax.nn.sigmoid(z[cout:, :])          # f32 sigmoid (EUP), safe on v5e
    o_ref[...] = (x1 * gate).astype(o_ref.dtype)


def _pick_tile(m, cap):
    """Largest lane-dense tile along the spatial axis that needs no padding."""
    if m <= cap:
        return m                      # full extent: always a legal block dim
    if m % 128 == 0:
        best = 128                    # 128 always divides m here
        t = 256
        while t <= cap:
            if m % t == 0:
                best = t
            t += 128
        return best
    # TODO(synk): for huge, non-128-multiple H*W consider a masked tail tile
    # instead of a single full-extent block.
    return m


def se_layer_pallas(x_nchw, w_keep, w_down, w_up, *, tile_m=2048):
    """x_nchw: (N, C, H, W). Weights in PyTorch Conv2d layout:
       w_keep: (Cout, C, 1, 1), w_down: (Cred, C, 1, 1), w_up: (Cout, Cred, 1, 1).
       Returns (N, Cout, H, W)."""
    N, C, H, W = x_nchw.shape
    Cout = w_keep.shape[0]
    dtype = x_nchw.dtype

    # 1x1 conv weights as plain matrices (out_ch, in_ch).
    wk = w_keep[:, :, 0, 0].astype(jnp.float32)   # (Cout, C)
    wd = w_down[:, :, 0, 0].astype(jnp.float32)   # (Cred, C)
    wu = w_up[:, :, 0, 0].astype(jnp.float32)     # (Cout, Cred)
    # MaxPool2d(1) == identity; no activation between convdown/convup =>
    # fold the SE branch into one matrix.
    w_se = wu @ wd                                 # (Cout, C)
    w_all = jnp.concatenate([wk, w_se], axis=0).astype(dtype)  # (2*Cout, C)

    M = H * W
    x3 = x_nchw.reshape(N, C, M)                   # pure reshape; no transpose

    tm = _pick_tile(M, tile_m)
    grid = (N, M // tm)

    itemsize = jnp.dtype(dtype).itemsize
    cost = pl.CostEstimate(
        flops=2 * N * M * C * (2 * Cout),
        transcendentals=N * M * Cout,
        bytes_accessed=N * M * (C + Cout) * itemsize + w_all.size * itemsize,
    )

    out3 = pl.pallas_call(
        _se_kernel,
        out_shape=jax.ShapeDtypeStruct((N, Cout, M), dtype),
        grid_spec=pltpu.PrefetchScalarGridSpec(
            num_scalar_prefetch=0,
            grid=grid,
            in_specs=[
                # streaming activations: (1, C, tm) blocks, batch dim squeezed
                pl.BlockSpec((None, C, tm), lambda b, m: (b, 0, m)),
                # tiny constant weight: whole array resident in VMEM
                pl.BlockSpec(memory_space=pltpu.MemorySpace.VMEM),
            ],
            out_specs=pl.BlockSpec((None, Cout, tm), lambda b, m: (b, 0, m)),
        ),
        compiler_params=pltpu.CompilerParams(
            dimension_semantics=("parallel", "parallel"),
        ),
        cost_estimate=cost,
    )(x3, w_all)

    return out3.reshape(N, Cout, H, W)


def _se_layer_ref(x_nchw, w_keep, w_down, w_up):
    """Pure-JAX reference matching the PyTorch forward exactly (no weight folding)."""
    wk = w_keep[:, :, 0, 0]
    wd = w_down[:, :, 0, 0]
    wu = w_up[:, :, 0, 0]
    x = x_nchw.astype(jnp.float32)
    x1 = jnp.einsum("nchw,oc->nohw", x, wk)
    y = jnp.einsum("nchw,rc->nrhw", x, wd)          # convdown
    # MaxPool2d(1) is identity.
    y = jax.nn.sigmoid(jnp.einsum("nrhw,or->nohw", y, wu))  # convup + sigmoid
    return (x1 * y).astype(x_nchw.dtype)


if __name__ == "__main__":
    # Module hyperparameters: SELayer(channel, out_channel, reduction).
    channel, out_channel, reduction = 4, 8, 2
    N, H, W = 2, 16, 16

    key = jax.random.PRNGKey(0)
    kx, k1, k2, k3 = jax.random.split(key, 4)

    x = jax.random.normal(kx, (N, channel, H, W), dtype=jnp.float32)
    # PyTorch Conv2d weight layout: (out, in, 1, 1).
    w_keep = jax.random.normal(k1, (out_channel, channel, 1, 1), dtype=jnp.float32) * 0.1
    w_down = jax.random.normal(k2, (channel // reduction, channel, 1, 1), dtype=jnp.float32) * 0.1
    w_up = jax.random.normal(k3, (out_channel, channel // reduction, 1, 1), dtype=jnp.float32) * 0.1

    out = jax.block_until_ready(se_layer_pallas(x, w_keep, w_down, w_up))
    ref = _se_layer_ref(x, w_keep, w_down, w_up)

    assert out.shape == (N, out_channel, H, W)
    assert jnp.allclose(out, ref, atol=1e-5, rtol=1e-5)

    print("KERNEL_OK")
</pallas_src>

<mosaic_0001>
module attributes {stable_mosaic.version = 11 : i64} {
  func.func @_se_kernel(%arg0: i32, %arg1: i32, %arg2: memref<1x4x256xf32, #tpu.memory_space<vmem>>, %arg3: memref<16x4xf32, #tpu.memory_space<vmem>>, %arg4: memref<1x8x256xf32, #tpu.memory_space<vmem>>) attributes {dimension_semantics = [#tpu.dimension_semantics<parallel>, #tpu.dimension_semantics<parallel>], iteration_bounds = array<i64: 2, 1>, scalar_prefetch = 0 : i64, scratch_operands = 0 : i64, tpu.core_type = #tpu.core_type<tc>, window_params = [{transform_indices = @transform_0, window_bounds = array<i64: 1, 4, 256>}, {pipeline_mode = #tpu.pipeline_mode<synchronous>, transform_indices = @transform_1, window_bounds = array<i64: 16, 4>}, {transform_indices = @transform_2, window_bounds = array<i64: 1, 8, 256>}]} {
    %c0 = arith.constant 0 : index
    %c0_0 = arith.constant 0 : index
    %0 = vector.load %arg3[%c0, %c0_0] : memref<16x4xf32, #tpu.memory_space<vmem>>, vector<16x4xf32>
    %c0_1 = arith.constant 0 : index
    %c0_2 = arith.constant 0 : index
    %c0_3 = arith.constant 0 : index
    %1 = vector.load %arg2[%c0_1, %c0_2, %c0_3] : memref<1x4x256xf32, #tpu.memory_space<vmem>>, vector<1x4x256xf32>
    %2 = vector.shape_cast %1 : vector<1x4x256xf32> to vector<4x256xf32>
    %cst = arith.constant dense<0.000000e+00> : vector<16x256xf32>
    %3 = tpu.matmul %0, %2, %cst {dimension_numbers = #tpu.dot_dimension_numbers<[1], [0], [0], [1], [0, 0, 1, 1], [], []>} : vector<16x4xf32>, vector<4x256xf32>, vector<16x256xf32> -> vector<16x256xf32>
    %4 = vector.extract_strided_slice %3 {offsets = [0, 0], sizes = [8, 256], strides = [1, 1]} : vector<16x256xf32> to vector<8x256xf32>
    %5 = vector.extract_strided_slice %3 {offsets = [8, 0], sizes = [8, 256], strides = [1, 1]} : vector<16x256xf32> to vector<8x256xf32>
    %6 = arith.negf %5 : vector<8x256xf32>
    %7 = math.exp %6 : vector<8x256xf32>
    %cst_4 = arith.constant 1.000000e+00 : f32
    %8 = vector.broadcast %cst_4 : f32 to vector<8x256xf32>
    %9 = arith.addf %8, %7 : vector<8x256xf32>
    %10 = arith.divf %8, %9 : vector<8x256xf32>
    %11 = arith.mulf %4, %10 : vector<8x256xf32>
    %c0_5 = arith.constant 0 : index
    %c0_6 = arith.constant 0 : index
    %c0_7 = arith.constant 0 : index
    %12 = vector.load %arg4[%c0_5, %c0_6, %c0_7] : memref<1x8x256xf32, #tpu.memory_space<vmem>>, vector<1x8x256xf32>
    %13 = vector.shape_cast %12 : vector<1x8x256xf32> to vector<8x256xf32>
    %14 = vector.shape_cast %11 : vector<8x256xf32> to vector<1x8x256xf32>
    tpu.vector_store %arg4[%c0_5, %c0_6, %c0_7], %14 {strides = array<i32>} : memref<1x8x256xf32, #tpu.memory_space<vmem>>, vector<1x8x256xf32>,
    return
  }
  func.func @transform_0(%arg0: i32, %arg1: i32) -> (i32, i32, i32) {
    %c0_i32 = arith.constant 0 : i32
    %c0_i32_0 = arith.constant 0 : i32
    return %arg0, %c0_i32, %arg1 : i32, i32, i32
  }
  func.func @transform_1(%arg0: i32, %arg1: i32) -> (i32, i32) {
    %c0_i32 = arith.constant 0 : i32
    %c0_i32_0 = arith.constant 0 : i32
    %c0_i32_1 = arith.constant 0 : i32
    return %c0_i32, %c0_i32_0 : i32, i32
  }
  func.func @transform_2(%arg0: i32, %arg1: i32) -> (i32, i32, i32) {
    %c0_i32 = arith.constant 0 : i32
    %c0_i32_0 = arith.constant 0 : i32
    return %arg0, %c0_i32, %arg1 : i32, i32, i32
  }
}

</mosaic_0001>

<bundles_post_ra>
// kernel: tpu_custom_call.1
= control target key start
LH: loop header
LB: loop body
LE: loop exit
PB: predicated region body
PF: predicated region fallthrough
CT: control target
= control target key end

     0   :  { %7 = vsyncpa [#allocation3], 0  ;;  %s679_s0 = inlined_call_operand.vmem [shape: f32[2,4,256], index: 0, kind: input, shape index: {}]   ;;  %s680_s1 = inlined_call_operand.vmem [shape: f32[16,4], index: 1, kind: input, shape index: {}]   ;;  %s681_s2 = inlined_call_operand.hbm [shape: f32[2,8,256], index: 2, kind: output, shape index: {}]  }
   0x1   :  { %9 = vsyncpa [#allocation3 + $0x1], 0  ;;  %s561_s9 = smov 0   ;;  %s563_s10 = smov 0  }
   0x2   :  { %s565_s11 = smov 0   ;;  %s567_s12 = smov 0  }
   0x3   :  { %s569_s13 = smov 0   ;;  %s571_s14 = smov 0  }
   0x4 LB: > { %s376_s15 = sadd.s32 4294967295, %s542_s14   ;;  %s377_s16 = sadd.s32 4294967294, %s542_s14   ;;  %s542_s14 = sphi %s571_s14, %s15_s14   ;;  %s538_s13 = sphi %s569_s13, %s688_s13   ;;  %s534_s12 = sphi %s567_s12, %s687_s12   ;;  %s530_s11 = sphi %s565_s11, %s686_s11   ;;  %s526_s10 = sphi %s563_s10, %s685_s10   ;;  %s522_s9 = sphi %s561_s9, %s684_s9  }
   0x5   : > { %s27_s17 = sadd.s32 1, %s538_s13  ;;  %s85_s18 = sadd.s32 1, %s530_s11 }
   0x6   : > { %p29_p0 = scmp.ge.s32.totalorder %s27_s17, 2  ;;  %p95_p1 = scmp.ne.s32.totalorder %s530_s11, %s526_s10 }
   0x7   : > { %p96_p2 = scmp.eq.s32.totalorder %s376_s15, 1  ;;  %p101_p3 = scmp.ne.s32.totalorder %s526_s10, %s522_s9 }
   0x8   : > { %s690_s17 = smov (%p29_p0, %s27_s17), 0  ;;  %p102_p5 = scmp.eq.s32.totalorder %s377_s16, 1 }
   0x9   : > { %p601_p4 = por %p96_p2, %p95_p1  ;;  %s80_s20 = ssub.s32 %s538_s13, %s690_s17 }
   0xa   : > { %p380_p6 = scmp.ge.s32.totalorder %s542_s14, 1  ;;  %p83_p7 = scmp.eq.s32.totalorder %s80_s20, 0 }
   0xb   : > { %p608_p8 = por %p102_p5, %p101_p3  ;;  %p136_p9 = scmp.lt.s32.totalorder %s542_s14, 3 }
   0xc   : > { %s614_s22 = scalar_select %p83_p7, %s530_s11, %s85_s18  }
   0xd   : > { %p137_p10 = pnand %p380_p6, %p136_p9 }
   0xe   : > { %p163_p11 = scmp.lt.s32.totalorder (!%p137_p10), %s534_s12, 1  ;;  %v544_v0 = vmov (!%p137_p10), 0.0   ;;  %vm185_vm0 = vcmask (!%p137_p10), 1043456   ;;  %v174_v3 = vld [vmem:[%s680_s1 + $0x8] sm:$0xff] (!%p137_p10)  ;;  %vm178_vm1 = vcmask (!%p137_p10), 31744   ;;  %v173_v4 = vld [vmem:[%s680_s1] sm:$0xff] (!%p137_p10) }
   0xf   : > { %140 = sbr.rel (%p137_p10) target bundleno = 286 (0x11e), region = 28  ;;  %260 = vmatprep.mubr.f32.mxu1 (!%p137_p10), %v544_v0  ;;  %254 = vmatprep.mubr.f32.mxu0 (!%p137_p10), %v544_v0  ;;  %s159_s4 = sand.u32 (!%p137_p10), 1, %s526_s10  }
  0x10   : > { %s381_s5 = sshll.u32 (!%p137_p10), %s159_s4, 4  ;;  %s396_s6 = sshll.u32 (!%p137_p10), %s534_s12, 8 }
  0x11   : > { %s161_s7 = scalar_lea.vmem (!%p137_p10), [#allocation2], %s381_s5  ;;  %s632_s18 = scalar_lea.hbm (!%p137_p10), %s681_s2, %s396_s6 }
  0x12   : > { %s300_s8 = sshll.u32 (!%p137_p10), %s161_s7, 4  ;;  %s284_s20 = scalar_lea.sflag (!%p137_p10), [#allocation3], %s159_s4  ;;  %s634_s8 = int_to_ptr.vmem [resolvable:$true] %s300_s8 }
  0x16   : > { %s164_s23 = scalar_select %p163_p11, %s534_s12, 1 }
  0x17   : > { %s464_s12 = scalar_lea.vmem %s634_s8, 256 }
  0x18   : > { %s395_s24 = sshll.u32 %s164_s23, 3  ;;  %p465_p12 = scmp.ne.s32.totalorder %s634_s8, %s464_s12 }
  0x19   : > { %s170_s27 = scalar_lea.vmem %s679_s0, %s395_s24  ;;  %s545_s23 = smov [#allocation2]  }
  0x1a   : > { %v175_v1 = vld [vmem:[%s170_s27] sm:$0xff]  ;;  %p466_p13 = pnand %p465_p12, %p601_p4  ;;  %s468_s24 = sshll.u32 %s545_s23, 4  ;;  %s469_s24 = int_to_ptr.vmem [resolvable:$false] %s468_s24 }
  0x1b   : > { %v177_v2 = vcombine.high %v175_v1, %v175_v1  ;;  %s470_s25 = scalar_lea.vmem %s469_s24, 512  ;;  %p471_p1 = scmp.lt.s32.totalorder %s634_s8, %s469_s24 }
  0x1c   : > { %p467_p0 = pneg %p466_p13  ;;  %p472_p2 = scmp.lt.s32.totalorder %s470_s25, %s464_s12 }
  0x1d   : > { %397 = vmatprep.subr.msk.mxu1 %vm185_vm0, %v177_v2  ;;  %384 = vmatprep.subr.msk.mxu0 %vm185_vm0, %v177_v2 }
  0x1e   : > { %398 = vmatpush1.msk.msra.mxu1 %vm185_vm0, %v175_v1  ;;  %385 = vmatpush1.msk.msra.mxu0 %vm185_vm0, %v175_v1  ;;  %p473_p3 = por %p472_p2, %p471_p1 }
  0x1f   : > { %387 = vmatmul.mubr.msk.f32.vlgmr.msra.gmra.mrb[0].mxu1 %vm178_vm1, %v174_v3  ;;  %386 = vmatmul.mubr.msk.f32.vlgmr.msra.gmra.mrb[0].mxu0 %vm178_vm1, %v173_v4 }
  0x20   : > { %p474_p5 = pnand %p473_p3, %p467_p0 }
  0xf2   : > { %v262_v5 = vpop.f32.mrb[0].mxu1  ;;  %v256_v6 = vpop.f32.mrb[0].mxu0 }
  0xf3   : > { %v388_v7 = vmul.f32 -1.442695, %v262_v5  ;;  %v264_v8 = vpop.f32.mrb[1].mxu1  ;;  %v258_v9 = vpop.f32.mrb[1].mxu0 }
  0xf4   : > { %v389_v10 = vmul.f32 -1.442695, %v264_v8 }
  0xf5   : > { %456 = vpow2.f32 %v388_v7 }
  0xf6   : > { %458 = vpow2.f32 %v389_v10 }
  0xff   : > { %v457_v11 = vpop.eup %456 }
 0x100   : > { %v459_v12 = vpop.eup %458  ;;  %v273_v13 = vadd.f32 1.0, %v457_v11 }
 0x101   : > { %v274_v14 = vadd.f32 1.0, %v459_v12 }
 0x102   : > { %460 = vrcp.f32 %v273_v13 }
 0x103   : > { %462 = vrcp.f32 %v274_v14 }
 0x10c   : > { %v461_v15 = vpop.eup %460 }
 0x10d   : > { %v463_v16 = vpop.eup %462  ;;  %v279_v17 = vmul.f32 %v461_v15, %v256_v6 }
 0x10e   : > { %v280_v18 = vmul.f32 %v463_v16, %v258_v9 }
 0x10f   : > { %281 = vst [vmem:[%s161_s7] sm:$0xff] %v279_v17 }
 0x110   : > { %282 = vst [vmem:[%s161_s7 + $0x8] sm:$0xff] %v280_v18 }
 0x111   : > { %477 = shalt.err (!%p474_p5)
}
 0x112   : > { %s478_s26 = scalar_lea.hbm %s632_s18, 256  ;;  %s482_s29 = scalar_lea.hbm %s681_s2, 512 }
 0x113   : > { %p479_p6 = scmp.ne.s32.totalorder %s632_s18, %s478_s26  ;;  %p483_p10 = scmp.lt.u32.totalorder %s632_s18, %s681_s2 }
 0x114   : > { %p484_p11 = scmp.lt.u32.totalorder %s482_s29, %s478_s26  ;;  %p486_p13 = scmp.lt.u32.totalorder %s478_s26, %s632_s18 }
 0x115   : > { %p480_p7 = pnand %p479_p6, %p601_p4 }
 0x116   : > { %p485_p12 = por %p484_p11, %p483_p10 }
 0x117   : > { %p481_p9 = pneg %p480_p7 }
 0x118   : > { %p487_p0 = por %p486_p13, %p485_p12 }
 0x11a   : > { %p488_p1 = pnand %p487_p0, %p481_p9 }
 0x11c   : > { %491 = shalt.err (!%p488_p1)
}
 0x11d   : > { %399 = dma.vmem_to_hbm [thread:$0]  (%p601_p4), %s634_s8, 256, %s632_s18, %s284_s20  }
 0x11e PF: > { %p405_p2 = scmp.ge.s32.totalorder %s542_s14, 2  ;;  %s312_s4 = sand.u32 1, %s522_s9  }
 0x11f   : > { %s313_s5 = scalar_lea.sflag [#allocation3], %s312_s4 }
 0x120   : > { %p402_p3 = pnand %p405_p2, %p608_p8 }
 0x122   : > { %517 = dma.done.wait (!%p402_p3), %s313_s5, 256  }
 0x123   : > { %519 = vsyncadd (!%p402_p3), %s313_s5, 4294967040  ;;  %s15_s14 = sadd.s32 1, %s542_s14   ;;  %s684_s9 = smov %s526_s10 }
 0x124   : > { %p12_p5 = scmp.ge.s32.totalorder %s15_s14, 4   ;;  %s685_s10 = smov %s530_s11 }
 0x125   : > { %s686_s11 = smov %s614_s22  ;;  %s687_s12 = smov %s538_s13 }
 0x126   : > { %s688_s13 = smov %s690_s17  ;;  %14 = sbr.rel (!%p12_p5) target bundleno = 4 (0x4), region = 63 }
 0x12d   :  { %318 = vsyncpa [#allocation3], 1 }
 0x12e   :  { %320 = vsyncpa [#allocation3 + $0x1], 1 }

</bundles_post_ra>
